<compile_context>
chip_gen: v7x
topology: tpu7x:2x2x1
jax: 0.10.0
libtpu: 0.0.40
codegen_flags: <defaults>
</compile_context>

<pallas_src>
import jax
import jax.numpy as jnp
from jax.experimental import pallas as pl
from jax.experimental.pallas import tpu as pltpu


# ---------------------------------------------------------------------------
# Helpers
# ---------------------------------------------------------------------------
def _round_up(x, m):
    return ((x + m - 1) // m) * m


def _pad_to(a, *target):
    pads = tuple((0, t - s) for s, t in zip(a.shape, target))
    if any(p[1] for p in pads):
        return jnp.pad(a, pads)
    return a


_VMEM_LIMIT = 32 * 1024 * 1024  # safe on v5e/v6e (128 MiB) and v7x (64 MiB physical VMEM)


# ---------------------------------------------------------------------------
# Kernels
# ---------------------------------------------------------------------------
def _linear_kernel(x_ref, w_ref, b_ref, o_ref, acc_ref):
    # Tiled  y = x @ w + b  with w pre-transposed to (K, N).
    # grid = (M tiles, K tiles); K (axis 1) is the reduction axis (last).
    k = pl.program_id(1)

    @pl.when(k == 0)
    def _():
        # Fold bias into accumulator init -> no extra add at finalize.
        acc_ref[...] = jnp.broadcast_to(b_ref[...], acc_ref.shape).astype(jnp.float32)

    acc_ref[...] += jnp.dot(
        x_ref[...], w_ref[...], preferred_element_type=jnp.float32
    )

    @pl.when(k == pl.num_programs(1) - 1)
    def _():
        o_ref[...] = acc_ref[...].astype(o_ref.dtype)


def _make_fused_kernel(emit_features):
    # Fused backbone (x @ WbT + bb) -> features kept in VMEM scratch ->
    # heads (features @ Wh_all + bh_all) written lane-dense.
    def kernel(x_ref, wb_ref, bb_ref, wh_ref, bh_ref, *refs):
        if emit_features:
            f_ref, o_ref, acc_ref = refs
        else:
            o_ref, acc_ref = refs

        k = pl.program_id(1)

        @pl.when(k == 0)
        def _():
            # Backbone bias folded into accumulator init.
            acc_ref[...] = jnp.broadcast_to(bb_ref[...], acc_ref.shape).astype(
                jnp.float32
            )

        acc_ref[...] += jnp.dot(
            x_ref[...], wb_ref[...], preferred_element_type=jnp.float32
        )

        @pl.when(k == pl.num_programs(1) - 1)
        def _():
            feats = acc_ref[...]                         # f32 features, VMEM-resident
            if emit_features:
                f_ref[...] = feats.astype(f_ref.dtype)
            o_ref[...] = (
                jnp.dot(
                    feats.astype(wh_ref.dtype),
                    wh_ref[...],
                    preferred_element_type=jnp.float32,
                )
                + bh_ref[...]
            ).astype(o_ref.dtype)

    return kernel


# ---------------------------------------------------------------------------
# Wrappers
# ---------------------------------------------------------------------------
def pallas_linear(x, w_t, b, compute_dtype=jnp.float32):
    """y = x @ w_t + b.  x: (B, K), w_t: (K, N) (already transposed), b: (N,)."""
    B, K = x.shape
    N = w_t.shape[1]

    tm = min(_round_up(B, 8), 256)
    tk = min(_round_up(K, 128), 512)
    Bp, Kp, Np = _round_up(B, tm), _round_up(K, tk), _round_up(N, 128)

    xp = _pad_to(x.astype(compute_dtype), Bp, Kp)
    wp = _pad_to(w_t.astype(compute_dtype), Kp, Np)
    bp = _pad_to(b.reshape(1, -1).astype(jnp.float32), 1, Np)

    out = pl.pallas_call(
        _linear_kernel,
        out_shape=jax.ShapeDtypeStruct((Bp, Np), jnp.float32),
        grid=(Bp // tm, Kp // tk),
        in_specs=[
            pl.BlockSpec((tm, tk), lambda i, k: (i, k)),
            pl.BlockSpec((tk, Np), lambda i, k: (k, 0)),
            pl.BlockSpec((1, Np), lambda i, k: (0, 0)),
        ],
        out_specs=pl.BlockSpec((tm, Np), lambda i, k: (i, 0)),
        scratch_shapes=[pltpu.VMEM((tm, Np), jnp.float32)],
        compiler_params=pltpu.CompilerParams(
            dimension_semantics=("parallel", "arbitrary"),
            vmem_limit_bytes=_VMEM_LIMIT,
        ),
    )(xp, wp, bp)
    return out[:B, :N]


def pallas_fused_backbone_heads(
    x_flat, w_b, b_b, w_heads, b_heads, compute_dtype=jnp.float32, return_features=False
):
    """Fused backbone + cluster heads.

    x_flat:  (B, F)
    w_b:     (D, F), b_b: (D,)
    w_heads: (H, C, D), b_heads: (H, C)
    Returns (B, H*C) head logits (and optionally (B, D) features).
    """
    B, F = x_flat.shape
    D = w_b.shape[0]
    H, C, _ = w_heads.shape
    N = H * C

    tm = min(_round_up(B, 8), 256)
    tk = min(_round_up(F, 128), 512)
    Bp, Fp = _round_up(B, tm), _round_up(F, tk)
    Dp = _round_up(D, 128)
    Np = _round_up(N, 128)

    xp = _pad_to(x_flat.astype(compute_dtype), Bp, Fp)                     # (Bp, Fp)
    wbp = _pad_to(w_b.T.astype(compute_dtype), Fp, Dp)                     # (Fp, Dp)
    bbp = _pad_to(b_b.reshape(1, -1).astype(jnp.float32), 1, Dp)           # (1, Dp)
    wh_all = jnp.transpose(w_heads, (2, 0, 1)).reshape(D, N)               # (D, H*C)
    whp = _pad_to(wh_all.astype(compute_dtype), Dp, Np)                    # (Dp, Np)
    bhp = _pad_to(b_heads.reshape(1, -1).astype(jnp.float32), 1, Np)       # (1, Np)

    if return_features:
        out_shape = (
            jax.ShapeDtypeStruct((Bp, Dp), jnp.float32),
            jax.ShapeDtypeStruct((Bp, Np), jnp.float32),
        )
        out_specs = (
            pl.BlockSpec((tm, Dp), lambda i, k: (i, 0)),
            pl.BlockSpec((tm, Np), lambda i, k: (i, 0)),
        )
    else:
        out_shape = jax.ShapeDtypeStruct((Bp, Np), jnp.float32)
        out_specs = pl.BlockSpec((tm, Np), lambda i, k: (i, 0))

    res = pl.pallas_call(
        _make_fused_kernel(return_features),
        out_shape=out_shape,
        grid=(Bp // tm, Fp // tk),
        in_specs=[
            pl.BlockSpec((tm, tk), lambda i, k: (i, k)),   # x tile
            pl.BlockSpec((tk, Dp), lambda i, k: (k, 0)),   # backbone weight^T tile
            pl.BlockSpec((1, Dp), lambda i, k: (0, 0)),    # backbone bias (resident)
            pl.BlockSpec((Dp, Np), lambda i, k: (0, 0)),   # combined head weights (resident)
            pl.BlockSpec((1, Np), lambda i, k: (0, 0)),    # combined head biases (resident)
        ],
        out_specs=out_specs,
        scratch_shapes=[pltpu.VMEM((tm, Dp), jnp.float32)],  # feature accumulator
        compiler_params=pltpu.CompilerParams(
            dimension_semantics=("parallel", "arbitrary"),
            vmem_limit_bytes=_VMEM_LIMIT,
        ),
    )(xp, wbp, bbp, whp, bhp)

    if return_features:
        feats_p, out_p = res
        return feats_p[:B, :D], out_p[:B, :N]
    return res[:B, :N]


def clustering_model_forward(x, params, forward_pass="default", compute_dtype=jnp.float32):
    """Mirrors ClusteringModel.forward (model_transform=None)."""
    w_b = params["w_backbone"]
    b_b = params["b_backbone"]
    w_heads = params["w_heads"]
    b_heads = params["b_heads"]
    H, C, D = w_heads.shape

    if forward_pass == "default":
        x_flat = x.reshape(x.shape[0], -1)
        out_flat = pallas_fused_backbone_heads(
            x_flat, w_b, b_b, w_heads, b_heads, compute_dtype=compute_dtype
        )
        return jnp.split(out_flat, H, axis=1)
    elif forward_pass == "backbone":
        x_flat = x.reshape(x.shape[0], -1)
        return pallas_linear(x_flat, w_b.T, b_b, compute_dtype=compute_dtype)
    elif forward_pass == "head":
        wh_all = jnp.transpose(w_heads, (2, 0, 1)).reshape(D, H * C)
        bh_all = b_heads.reshape(-1)
        out_flat = pallas_linear(x, wh_all, bh_all, compute_dtype=compute_dtype)
        return jnp.split(out_flat, H, axis=1)
    elif forward_pass == "return_all":
        x_flat = x.reshape(x.shape[0], -1)
        feats, out_flat = pallas_fused_backbone_heads(
            x_flat, w_b, b_b, w_heads, b_heads,
            compute_dtype=compute_dtype, return_features=True,
        )
        return {"features": feats, "output": jnp.split(out_flat, H, axis=1)}
    else:
        raise ValueError("Invalid forward pass {}".format(forward_pass))


# ---------------------------------------------------------------------------
# Main
# ---------------------------------------------------------------------------
if __name__ == "__main__":
    # Small, deterministic shapes.
    B, C_in, H_img, W_img = 2, 4, 16, 16
    backbone_dim = 32
    nclusters = 10
    nheads = 2
    F = C_in * H_img * W_img

    key = jax.random.PRNGKey(0)
    k_x, k_wb, k_bb, k_wh, k_bh = jax.random.split(key, 5)

    x = jax.random.normal(k_x, (B, C_in, H_img, W_img), dtype=jnp.float32)

    params = {
        # synthetic backbone: Linear(F -> backbone_dim)
        "w_backbone": jax.random.normal(k_wb, (backbone_dim, F), jnp.float32) * 0.02,
        "b_backbone": jax.random.normal(k_bb, (backbone_dim,), jnp.float32) * 0.02,
        # cluster heads: nheads x Linear(backbone_dim -> nclusters)
        "w_heads": jax.random.normal(k_wh, (nheads, nclusters, backbone_dim), jnp.float32) * 0.02,
        "b_heads": jax.random.normal(k_bh, (nheads, nclusters), jnp.float32) * 0.02,
    }

    # Pure-JAX reference.
    x_flat = x.reshape(B, -1)
    feats_ref = x_flat @ params["w_backbone"].T + params["b_backbone"]
    heads_ref = [
        feats_ref @ params["w_heads"][h].T + params["b_heads"][h] for h in range(nheads)
    ]

    # ---- default (fused backbone + heads) ----
    out = clustering_model_forward(x, params, forward_pass="default")
    out = [jax.block_until_ready(o) for o in out]
    for h in range(nheads):
        assert out[h].shape == (B, nclusters)
        assert jnp.allclose(out[h], heads_ref[h], atol=1e-4, rtol=1e-4)

    # ---- backbone only ----
    feats = jax.block_until_ready(
        clustering_model_forward(x, params, forward_pass="backbone")
    )
    assert feats.shape == (B, backbone_dim)
    assert jnp.allclose(feats, feats_ref, atol=1e-4, rtol=1e-4)

    # ---- head only (features in, per-head logits out) ----
    out_h = clustering_model_forward(feats_ref, params, forward_pass="head")
    out_h = [jax.block_until_ready(o) for o in out_h]
    for h in range(nheads):
        assert jnp.allclose(out_h[h], heads_ref[h], atol=1e-4, rtol=1e-4)

    # ---- return_all (fused, also emits features) ----
    all_out = clustering_model_forward(x, params, forward_pass="return_all")
    jax.block_until_ready(all_out["features"])
    assert jnp.allclose(all_out["features"], feats_ref, atol=1e-4, rtol=1e-4)
    for h in range(nheads):
        assert jnp.allclose(all_out["output"][h], heads_ref[h], atol=1e-4, rtol=1e-4)

    print("KERNEL_OK")
</pallas_src>

<mosaic_0001>
module attributes {stable_mosaic.version = 11 : i64} {
  func.func @kernel(%arg0: i32, %arg1: i32, %arg2: memref<8x512xf32, #tpu.memory_space<vmem>>, %arg3: memref<512x128xf32, #tpu.memory_space<vmem>>, %arg4: memref<1x128xf32, #tpu.memory_space<vmem>>, %arg5: memref<128x128xf32, #tpu.memory_space<vmem>>, %arg6: memref<1x128xf32, #tpu.memory_space<vmem>>, %arg7: memref<8x128xf32, #tpu.memory_space<vmem>>, %arg8: memref<8x128xf32, #tpu.memory_space<vmem>>) attributes {dimension_semantics = [#tpu.dimension_semantics<parallel>, #tpu.dimension_semantics<arbitrary>], iteration_bounds = array<i64: 1, 2>, scalar_prefetch = 0 : i64, scratch_operands = 1 : i64, tpu.core_type = #tpu.core_type<tc>, window_params = [{transform_indices = @transform_0, window_bounds = array<i64: 8, 512>}, {transform_indices = @transform_1, window_bounds = array<i64: 512, 128>}, {pipeline_mode = #tpu.pipeline_mode<synchronous>, transform_indices = @transform_2, window_bounds = array<i64: 1, 128>}, {pipeline_mode = #tpu.pipeline_mode<synchronous>, transform_indices = @transform_3, window_bounds = array<i64: 128, 128>}, {pipeline_mode = #tpu.pipeline_mode<synchronous>, transform_indices = @transform_4, window_bounds = array<i64: 1, 128>}, {transform_indices = @transform_5, window_bounds = array<i64: 8, 128>}]} {
    %c0_i32 = arith.constant 0 : i32
    %0 = arith.cmpi eq, %arg1, %c0_i32 : i32
    %1 = arith.extui %0 : i1 to i32
    %c0_i32_0 = arith.constant 0 : i32
    %2 = arith.cmpi ne, %1, %c0_i32_0 : i32
    scf.if %2 {
      %c0_9 = arith.constant 0 : index
      %c0_10 = arith.constant 0 : index
      %12 = vector.load %arg4[%c0_9, %c0_10] : memref<1x128xf32, #tpu.memory_space<vmem>>, vector<1x128xf32>
      %13 = vector.shape_cast %12 : vector<1x128xf32> to vector<1x128xf32>
      %14 = vector.broadcast %13 : vector<1x128xf32> to vector<8x128xf32>
      %c0_11 = arith.constant 0 : index
      %c0_12 = arith.constant 0 : index
      %15 = vector.load %arg8[%c0_11, %c0_12] : memref<8x128xf32, #tpu.memory_space<vmem>>, vector<8x128xf32>
      tpu.vector_store %arg8[%c0_11, %c0_12], %14 {strides = array<i32>} : memref<8x128xf32, #tpu.memory_space<vmem>>, vector<8x128xf32>,
    } else {
    }
    %c0 = arith.constant 0 : index
    %c0_1 = arith.constant 0 : index
    %3 = vector.load %arg8[%c0, %c0_1] : memref<8x128xf32, #tpu.memory_space<vmem>>, vector<8x128xf32>
    %c0_2 = arith.constant 0 : index
    %c0_3 = arith.constant 0 : index
    %4 = vector.load %arg2[%c0_2, %c0_3] : memref<8x512xf32, #tpu.memory_space<vmem>>, vector<8x512xf32>
    %c0_4 = arith.constant 0 : index
    %c0_5 = arith.constant 0 : index
    %5 = vector.load %arg3[%c0_4, %c0_5] : memref<512x128xf32, #tpu.memory_space<vmem>>, vector<512x128xf32>
    %cst = arith.constant dense<0.000000e+00> : vector<8x128xf32>
    %6 = tpu.matmul %4, %5, %cst {dimension_numbers = #tpu.dot_dimension_numbers<[1], [0], [0], [1], [0, 0, 1, 1], [], []>} : vector<8x512xf32>, vector<512x128xf32>, vector<8x128xf32> -> vector<8x128xf32>
    %7 = arith.addf %3, %6 : vector<8x128xf32>
    %c0_6 = arith.constant 0 : index
    %c0_7 = arith.constant 0 : index
    %8 = vector.load %arg8[%c0_6, %c0_7] : memref<8x128xf32, #tpu.memory_space<vmem>>, vector<8x128xf32>
    tpu.vector_store %arg8[%c0_6, %c0_7], %7 {strides = array<i32>} : memref<8x128xf32, #tpu.memory_space<vmem>>, vector<8x128xf32>,
    %c1_i32 = arith.constant 1 : i32
    %9 = arith.cmpi eq, %arg1, %c1_i32 : i32
    %10 = arith.extui %9 : i1 to i32
    %c0_i32_8 = arith.constant 0 : i32
    %11 = arith.cmpi ne, %10, %c0_i32_8 : i32
    scf.if %11 {
      %c0_9 = arith.constant 0 : index
      %c0_10 = arith.constant 0 : index
      %12 = vector.load %arg8[%c0_9, %c0_10] : memref<8x128xf32, #tpu.memory_space<vmem>>, vector<8x128xf32>
      %c0_11 = arith.constant 0 : index
      %c0_12 = arith.constant 0 : index
      %13 = vector.load %arg5[%c0_11, %c0_12] : memref<128x128xf32, #tpu.memory_space<vmem>>, vector<128x128xf32>
      %cst_13 = arith.constant dense<0.000000e+00> : vector<8x128xf32>
      %14 = tpu.matmul %12, %13, %cst_13 {dimension_numbers = #tpu.dot_dimension_numbers<[1], [0], [0], [1], [0, 0, 1, 1], [], []>} : vector<8x128xf32>, vector<128x128xf32>, vector<8x128xf32> -> vector<8x128xf32>
      %c0_14 = arith.constant 0 : index
      %c0_15 = arith.constant 0 : index
      %15 = vector.load %arg6[%c0_14, %c0_15] : memref<1x128xf32, #tpu.memory_space<vmem>>, vector<1x128xf32>
      %16 = vector.broadcast %15 : vector<1x128xf32> to vector<8x128xf32>
      %17 = arith.addf %14, %16 : vector<8x128xf32>
      %c0_16 = arith.constant 0 : index
      %c0_17 = arith.constant 0 : index
      %18 = vector.load %arg7[%c0_16, %c0_17] : memref<8x128xf32, #tpu.memory_space<vmem>>, vector<8x128xf32>
      tpu.vector_store %arg7[%c0_16, %c0_17], %17 {strides = array<i32>} : memref<8x128xf32, #tpu.memory_space<vmem>>, vector<8x128xf32>,
    } else {
    }
    return
  }
  func.func @transform_0(%arg0: i32, %arg1: i32) -> (i32, i32) {
    %c0_i32 = arith.constant 0 : i32
    return %arg0, %arg1 : i32, i32
  }
  func.func @transform_1(%arg0: i32, %arg1: i32) -> (i32, i32) {
    %c0_i32 = arith.constant 0 : i32
    %c0_i32_0 = arith.constant 0 : i32
    return %arg1, %c0_i32 : i32, i32
  }
  func.func @transform_2(%arg0: i32, %arg1: i32) -> (i32, i32) {
    %c0_i32 = arith.constant 0 : i32
    %c0_i32_0 = arith.constant 0 : i32
    %c0_i32_1 = arith.constant 0 : i32
    return %c0_i32, %c0_i32_0 : i32, i32
  }
  func.func @transform_3(%arg0: i32, %arg1: i32) -> (i32, i32) {
    %c0_i32 = arith.constant 0 : i32
    %c0_i32_0 = arith.constant 0 : i32
    %c0_i32_1 = arith.constant 0 : i32
    return %c0_i32, %c0_i32_0 : i32, i32
  }
  func.func @transform_4(%arg0: i32, %arg1: i32) -> (i32, i32) {
    %c0_i32 = arith.constant 0 : i32
    %c0_i32_0 = arith.constant 0 : i32
    %c0_i32_1 = arith.constant 0 : i32
    return %c0_i32, %c0_i32_0 : i32, i32
  }
  func.func @transform_5(%arg0: i32, %arg1: i32) -> (i32, i32) {
    %c0_i32 = arith.constant 0 : i32
    %c0_i32_0 = arith.constant 0 : i32
    return %arg0, %c0_i32 : i32, i32
  }
}

</mosaic_0001>

<bundles_post_ra>
// kernel: tpu_custom_call.1
= control target key start
LH: loop header
LB: loop body
LE: loop exit
PB: predicated region body
PF: predicated region fallthrough
CT: control target
= control target key end

     0   :  { %10 = vsyncpa [#allocation4], 0  ;;  %s1572_s0 = inlined_call_operand.hbm [shape: f32[8,1024], index: 0, kind: input, shape index: {}]   ;;  %s1573_s1 = inlined_call_operand.hbm [shape: f32[1024,128], index: 1, kind: input, shape index: {}]   ;;  %s1574_s2 = inlined_call_operand.vmem [shape: f32[1,128], index: 2, kind: input, shape index: {}]   ;;  %s1575_s3 = inlined_call_operand.hbm [shape: f32[128,128], index: 3, kind: input, shape index: {}]   ;;  %s1576_s4 = inlined_call_operand.vmem [shape: f32[1,128], index: 4, kind: input, shape index: {}]   ;;  %s1577_s5 = inlined_call_operand.hbm [shape: f32[8,128], index: 5, kind: output, shape index: {}]  }
   0x1   :  { %12 = vsyncpa [#allocation4 + $0x1], 0 }
   0x2   :  { %13 = vsyncpa [#allocation7], 0 }
   0x3   :  { %15 = vsyncpa [#allocation7 + $0x1], 0 }
   0x4   :  { %16 = vsyncpa [#allocation5], 0  ;;  %s1267_s18 = smov 0   ;;  %s1269_s19 = smov 0  }
   0x5   :  { %s1271_s20 = smov 0   ;;  %s1273_s21 = smov 0  }
   0x6   :  { %s1275_s22 = smov 0   ;;  %s1277_s23 = smov 0  }
   0x7 LB: > { %s1296_s24 = sadd.s32 4294967295, %s1226_s23   ;;  %p56_p0 = scmp.ne.s32.totalorder %s1210_s19, %s1206_s18  ;;  %s1226_s23 = sphi %s1277_s23, %s22_s23   ;;  %s1222_s22 = sphi %s1275_s22, %s1597_s22   ;;  %s1218_s21 = sphi %s1273_s21, %s1596_s21   ;;  %s1214_s20 = sphi %s1271_s20, %s1595_s20   ;;  %s1210_s19 = sphi %s1269_s19, %s1594_s19   ;;  %s1206_s18 = sphi %s1267_s18, %s1593_s18  }
   0x8   : > { %p1578_p1 = scmp.eq.s32.totalorder %s1296_s24, 0  ;;  %p734_p2 = scmp.ge.s32.totalorder %s1226_s23, 1 }
   0x9   : > { %p182_p3 = scmp.lt.s32.totalorder %s1226_s23, 3  ;;  %s1228_s27 = smov [#allocation8]  }
   0xa   : > { %p1304_p4 = por %p1578_p1, %p56_p0  ;;  %s197_s28 = sshll.u32 %s1228_s27, 4  ;;  %s198_s28 = int_to_ptr.vmem [resolvable:$true] %s197_s28 }
   0xb   : > { %p1308_p5 = pnand %p734_p2, %p182_p3  ;;  %s31_s30 = sadd.s32 1, %s1222_s22 }
   0xc   : > { %s1583_s25 = scalar_select %p1304_p4, 1, 0 }
   0xd   : > { %s1584_s26 = scalar_select %p1308_p5, 1, 0 }
   0xe   : > { %p979_p6 = pneg %p1308_p5  ;;  %s1050_s8 = scalar_lea.hbm %s1575_s3, 2048 }
   0xf   : > { %p1051_p8 = scmp.ne.s32.totalorder %s1575_s3, %s1050_s8  ;;  %p1057_p12 = scmp.lt.u32.totalorder %s1050_s8, %s1575_s3 }
  0x10   : > { %p1316_p7 = pnand %p979_p6, %p1578_p1 }
  0x12   : > { %p1052_p9 = pneg %p1316_p7 }
  0x14   : > { %p1053_p10 = pnand %p1052_p9, %p1051_p8 }
  0x16   : > { %p1054_p11 = pneg %p1053_p10 }
  0x18   : > { %p1059_p13 = pnand %p1057_p12, %p1054_p11 }
  0x1a   : > { %1062 = shalt.err (!%p1059_p13)
}
  0x1b   : > { %s1063_s13 = scalar_lea.vmem %s198_s28, 2048  ;;  %p1071_p6 = scmp.lt.s32.totalorder %s198_s28, %s198_s28 }
  0x1c   : > { %p1064_p0 = scmp.ne.s32.totalorder %s198_s28, %s1063_s13  ;;  %p1072_p1 = scmp.lt.s32.totalorder %s1063_s13, %s1063_s13 }
  0x1e   : > { %p1066_p2 = pnand %p1064_p0, %p1052_p9  ;;  %p1073_p4 = por %p1072_p1, %p1071_p6 }
  0x20   : > { %p1067_p3 = pneg %p1066_p2 }
  0x22   : > { %p1074_p5 = pnand %p1073_p4, %p1067_p3 }
  0x24   : > { %1077 = shalt.err (!%p1074_p5)
}
  0x25   : > { %s1581_s14 = smov 128   ;;  %s1582_s15 = smov 8  }
  0x26   : > { %982 = dma.hbm_to_vmem [thread:$0]  (!%p1316_p7), %s1575_s3, 2048, %s198_s28, [#allocation7], %s1581_s14, %s1581_s14, %s1582_s15  }
  0x27   : > { %p32_p1 = scmp.ge.s32.totalorder %s31_s30, 2  ;;  %s43_s18 = sadd.s32 1, %s1214_s20 }
  0x28   : > { %p50_p4 = scmp.ne.s32.totalorder %s1214_s20, %s1210_s19  ;;  %p51_p5 = scmp.eq.s32.totalorder %s1226_s23, 0 }
  0x29   : > { %s1599_s30 = smov (%p32_p1, %s31_s30), 0  ;;  %p991_p9 = scmp.lt.s32.totalorder %s1226_s23, 2 }
  0x2a   : > { %p52_p8 = por %p51_p5, %p50_p4  ;;  %s39_s27 = ssub.s32 %s1222_s22, %s1599_s30 }
  0x2b   : > { %s1350_s6 = sand.u32 1, %s1214_s20   ;;  %p41_p10 = scmp.eq.s32.totalorder %s39_s27, 0 }
  0x2c   : > { %s737_s29 = sshll.u32 %s1350_s6, 5  ;;  %s755_s7 = sshll.u32 %s1222_s22, 9 }
  0x2d   : > { %s1355_s8 = scalar_select %p41_p10, %s1214_s20, %s43_s18  }
  0x2e   : > { %s1360_s10 = scalar_lea.hbm %s1572_s0, %s755_s7  ;;  %s218_s11 = scalar_lea.vmem [#allocation3], %s737_s29 }
  0x2f   : > { %s228_s12 = sshll.u32 %s218_s11, 4  ;;  %p1362_p7 = pnand %p991_p9, %p52_p8  ;;  %s1366_s12 = int_to_ptr.vmem [resolvable:$true] %s228_s12 }
  0x30   : > { %s740_s16 = sshll.u32 %s1350_s6, 9  ;;  %s215_s17 = scalar_lea.sflag [#allocation4], %s1350_s6 }
  0x31   : > { %s1078_s18 = scalar_lea.hbm %s1360_s10, 512  ;;  %p1080_p12 = pneg %p1362_p7 }
  0x32   : > { %p1079_p11 = scmp.ne.s32.totalorder %s1360_s10, %s1078_s18  ;;  %s1083_s7 = scalar_lea.hbm %s1572_s0, 1024 }
  0x33   : > { %p1084_p2 = scmp.lt.u32.totalorder %s1360_s10, %s1572_s0  ;;  %p1085_p3 = scmp.lt.u32.totalorder %s1083_s7, %s1078_s18 }
  0x34   : > { %p1081_p13 = pnand %p1080_p12, %p1079_p11  ;;  %p1087_p1 = scmp.lt.u32.totalorder %s1078_s18, %s1360_s10 }
  0x35   : > { %p1086_p6 = por %p1085_p3, %p1084_p2 }
  0x36   : > { %p1082_p0 = pneg %p1081_p13 }
  0x37   : > { %p1088_p4 = por %p1087_p1, %p1086_p6 }
  0x39   : > { %p1089_p5 = pnand %p1088_p4, %p1082_p0 }
  0x3b   : > { %1092 = shalt.err (!%p1089_p5)
}
  0x3c   : > { %s1093_s11 = scalar_lea.vmem %s1366_s12, 512  ;;  %s1231_s27 = smov [#allocation3]  }
  0x3d   : > { %p1094_p8 = scmp.ne.s32.totalorder %s1366_s12, %s1093_s11  ;;  %s1098_s29 = sshll.u32 %s1231_s27, 4  ;;  %s1099_s29 = int_to_ptr.vmem [resolvable:$false] %s1098_s29 }
  0x3e   : > { %s1100_s28 = scalar_lea.vmem %s1099_s29, 1024  ;;  %p1101_p11 = scmp.lt.s32.totalorder %s1366_s12, %s1099_s29 }
  0x3f   : > { %p1096_p9 = pnand %p1094_p8, %p1080_p12  ;;  %p1102_p13 = scmp.lt.s32.totalorder %s1100_s28, %s1093_s11 }
  0x41   : > { %p1097_p10 = pneg %p1096_p9  ;;  %p1103_p2 = por %p1102_p13, %p1101_p11 }
  0x43   : > { %p1104_p3 = pnand %p1103_p2, %p1097_p10 }
  0x45   : > { %1107 = shalt.err (!%p1104_p3)
}
  0x46   : > { %986 = dma.hbm_to_vmem [thread:$0]  (!%p1362_p7), %s1360_s10, 512, %s1366_s12, %s215_s17  }
  0x47   : > { %s756_s18 = sshll.u32 %s1222_s22, 13  ;;  %s239_s7 = scalar_lea.vmem [#allocation6], %s740_s16 }
  0x48   : > { %s246_s9 = sshll.u32 %s239_s7, 4  ;;  %s235_s27 = sand.u32 1, %s1226_s23   ;;  %s1398_s9 = int_to_ptr.vmem [resolvable:$true] %s246_s9 }
  0x49   : > { %s1404_s28 = scalar_lea.hbm %s1573_s1, %s756_s18  ;;  %s1406_s14 = scalar_lea.sflag [#allocation7], %s235_s27 }
  0x4a   : > { %s1108_s15 = scalar_lea.hbm %s1404_s28, 8192  ;;  %s1113_s12 = scalar_lea.hbm %s1573_s1, 16384 }
  0x4b   : > { %p1109_p0 = scmp.ne.s32.totalorder %s1404_s28, %s1108_s15  ;;  %p1114_p4 = scmp.lt.u32.totalorder %s1404_s28, %s1573_s1 }
  0x4c   : > { %p1115_p5 = scmp.lt.u32.totalorder %s1113_s12, %s1108_s15  ;;  %p1117_p9 = scmp.lt.u32.totalorder %s1108_s15, %s1404_s28 }
  0x4d   : > { %p1111_p6 = pnand %p1109_p0, %p1080_p12 }
  0x4e   : > { %p1116_p8 = por %p1115_p5, %p1114_p4 }
  0x4f   : > { %p1112_p1 = pneg %p1111_p6 }
  0x50   : > { %p1118_p10 = por %p1117_p9, %p1116_p8 }
  0x52   : > { %p1119_p11 = pnand %p1118_p10, %p1112_p1 }
  0x54   : > { %1122 = shalt.err (!%p1119_p11)
}
  0x55   : > { %s1123_s18 = scalar_lea.vmem %s1398_s9, 8192  ;;  %s1232_s7 = smov [#allocation6]  }
  0x56   : > { %p1124_p13 = scmp.ne.s32.totalorder %s1398_s9, %s1123_s18  ;;  %s1128_s27 = sshll.u32 %s1232_s7, 4  ;;  %s1129_s27 = int_to_ptr.vmem [resolvable:$false] %s1128_s27 }
  0x57   : > { %s1130_s11 = scalar_lea.vmem %s1129_s27, 16384  ;;  %p1131_p0 = scmp.lt.s32.totalorder %s1398_s9, %s1129_s27 }
  0x58   : > { %p1126_p2 = pnand %p1124_p13, %p1080_p12  ;;  %p1132_p6 = scmp.lt.s32.totalorder %s1130_s11, %s1123_s18 }
  0x5a   : > { %p1127_p3 = pneg %p1126_p2  ;;  %p1133_p4 = por %p1132_p6, %p1131_p0 }
  0x5c   : > { %p1134_p5 = pnand %p1133_p4, %p1127_p3 }
  0x5e   : > { %1137 = shalt.err (!%p1134_p5)
}
  0x5f   : > { %s1587_s15 = smov 8   ;;  %s1588_s29 = smov 128  }
  0x60   : > { %989 = dma.hbm_to_vmem [thread:$0]  (!%p1362_p7), %s1404_s28, 8192, %s1398_s9, %s1406_s14, %s1588_s29, %s1588_s29, %s1587_s15  }
  0x61   : > { %p1589_p12 = scmp.ne.s32.totalorder %s1584_s26, 0 }
  0x62   : > { %s260_s6 = sand.u32 (!%p1589_p12), 1, %s1210_s19   ;;  %p1590_p1 = scmp.ne.s32.totalorder (!%p1589_p12), %s1583_s25, 0 }
  0x63   : > { %258 = sbr.rel (%p1589_p12) target bundleno = 626 (0x272), region = 40  ;;  %s744_s10 = sshll.u32 (!%p1589_p12), %s260_s6, 5 }
  0x64   : > { %s261_s12 = scalar_lea.sflag (!%p1589_p12), [#allocation4], %s260_s6  ;;  %s1438_s16 = scalar_lea.vmem (!%p1589_p12), [#allocation3], %s744_s10 }
  0x6a   : > { %1189 = dma.done.wait (%p1590_p1), %s261_s12, 512  }
  0x6b   : > { %1191 = vsyncadd (%p1590_p1), %s261_s12, 4294966784  ;;  %s269_s13 = sand.u32 1, %s1296_s24   ;;  %s745_s17 = sshll.u32 %s260_s6, 9 }
  0x6c   : > { %s270_s14 = scalar_lea.sflag [#allocation7], %s269_s13  ;;  %s1445_s9 = scalar_lea.vmem [#allocation6], %s745_s17 }
  0x6d   : > { %1193 = dma.done.wait (%p1590_p1), %s270_s14, 8192  }
  0x6e   : > { %1195 = vsyncadd (%p1590_p1), %s270_s14, 4294959104  ;;  %p1591_p7 = scmp.eq.s32.totalorder %s1296_s24, 0 }
  0x70   : > { %1197 = dma.done.wait (%p1591_p7), [#allocation7], 2048   ;;  %p1592_p8 = pmov %p1591_p7 }
  0x71   : > { %p747_p9 = scmp.ne.s32.totalorder %s1218_s21, 0 }
  0x72   : > { %1199 = vsyncadd (%p1592_p8), [#allocation7], 4294965248  ;;  %v748_v0 = vld [vmem:[%s1574_s2] ss:$0 sm:$0xff] (!%p747_p9) }
  0x73   : > { %309 = sbr.rel (%p747_p9) target bundleno = 122 (0x7a), region = 56  ;;  %317 = vst [vmem:[#allocation2] sm:$0xff] (!%p747_p9), %v748_v0 }
  0x7a PF: > { %v339_v1 = vld [vmem:[%s1445_s9 + $0x80] sm:$0xff]  ;;  %v340_v2 = vld [vmem:[%s1445_s9 + $0x88] sm:$0xff]  ;;  %v341_v12 = vld [vmem:[%s1445_s9 + $0x90] sm:$0xff]  ;;  %p749_p10 = scmp.ne.s32.totalorder %s1218_s21, 1 }
  0x7b   : > { %v371_v3 = vld [vmem:[%s1445_s9 + $0x180] sm:$0xff]  ;;  %v879_v4 = vpack.c.bf16 %v340_v2, %v339_v1  ;;  %v372_v5 = vld [vmem:[%s1445_s9 + $0x188] sm:$0xff]  ;;  %v342_v14 = vld [vmem:[%s1445_s9 + $0x98] sm:$0xff]  ;;  %vm1234_vm0 = vmmov (!%p749_p10), 0  }
  0x7c   : > { %v323_v6 = vld [vmem:[%s1445_s9] sm:$0xff]  ;;  %v324_v7 = vld [vmem:[%s1445_s9 + $0x8] sm:$0xff]  ;;  %v911_v8 = vpack.c.bf16 %v372_v5, %v371_v3  ;;  %v373_v15 = vld [vmem:[%s1445_s9 + $0x190] sm:$0xff]  ;;  %v883_v17 = vpack.c.bf16 %v342_v14, %v341_v12 }
  0x7d   : > { %v881_v9 = vpack.c.bf16 %v324_v7, %v323_v6  ;;  %v355_v10 = vld [vmem:[%s1445_s9 + $0x100] sm:$0xff]  ;;  %v356_v11 = vld [vmem:[%s1445_s9 + $0x108] sm:$0xff]  ;;  %880 = vmatprep.subr.bf16.mxu0 %v879_v4  ;;  %v374_v16 = vld [vmem:[%s1445_s9 + $0x198] sm:$0xff] }
  0x7e   : > { %v913_v13 = vpack.c.bf16 %v356_v11, %v355_v10  ;;  %912 = vmatprep.subr.bf16.mxu1 %v911_v8  ;;  %v915_v18 = vpack.c.bf16 %v374_v16, %v373_v15  ;;  %v325_v19 = vld [vmem:[%s1445_s9 + $0x10] sm:$0xff]  ;;  %v326_v20 = vld [vmem:[%s1445_s9 + $0x18] sm:$0xff]  ;;  %v343_v24 = vld [vmem:[%s1445_s9 + $0xa0] sm:$0xff] }
  0x7f   : > { %882 = vmatpush3.bf16.msra.mxu0 %v881_v9  ;;  %v357_v21 = vld [vmem:[%s1445_s9 + $0x110] sm:$0xff]  ;;  %v885_v22 = vpack.c.bf16 %v326_v20, %v325_v19  ;;  %v358_v23 = vld [vmem:[%s1445_s9 + $0x118] sm:$0xff]  ;;  %v344_v25 = vld [vmem:[%s1445_s9 + $0xa8] sm:$0xff] }
  0x80   : > { %914 = vmatpush3.bf16.msra.mxu1 %v913_v13  ;;  %884 = vmatprep.subr.bf16.mxu0 %v883_v17  ;;  %v917_v26 = vpack.c.bf16 %v358_v23, %v357_v21  ;;  %v887_v27 = vpack.c.bf16 %v344_v25, %v343_v24  ;;  %v375_v28 = vld [vmem:[%s1445_s9 + $0x1a0] sm:$0xff]  ;;  %v376_v29 = vld [vmem:[%s1445_s9 + $0x1a8] sm:$0xff]  ;;  %v345_v36 = vld [vmem:[%s1445_s9 + $0xb0] sm:$0xff] }
  0x81   : > { %916 = vmatprep.subr.bf16.mxu1 %v915_v18  ;;  %v327_v30 = vld [vmem:[%s1445_s9 + $0x20] sm:$0xff]  ;;  %v919_v31 = vpack.c.bf16 %v376_v29, %v375_v28  ;;  %v328_v32 = vld [vmem:[%s1445_s9 + $0x28] sm:$0xff]  ;;  %v346_v37 = vld [vmem:[%s1445_s9 + $0xb8] sm:$0xff] }
  0x82   : > { %v359_v33 = vld [vmem:[%s1445_s9 + $0x120] sm:$0xff]  ;;  %v360_v34 = vld [vmem:[%s1445_s9 + $0x128] sm:$0xff]  ;;  %v889_v35 = vpack.c.bf16 %v328_v32, %v327_v30  ;;  %v377_v38 = vld [vmem:[%s1445_s9 + $0x1b0] sm:$0xff]  ;;  %v891_v40 = vpack.c.bf16 %v346_v37, %v345_v36 }
  0x83   : > { %886 = vmatpush3.bf16.msra.mxu0 %v885_v22  ;;  %v921_v39 = vpack.c.bf16 %v360_v34, %v359_v33  ;;  %v378_v41 = vld [vmem:[%s1445_s9 + $0x1b8] sm:$0xff]  ;;  %v329_v42 = vld [vmem:[%s1445_s9 + $0x30] sm:$0xff]  ;;  %v347_v47 = vld [vmem:[%s1445_s9 + $0xc0] sm:$0xff] }
  0x84   : > { %918 = vmatpush3.bf16.msra.mxu1 %v917_v26  ;;  %888 = vmatprep.subr.bf16.mxu0 %v887_v27  ;;  %v330_v43 = vld [vmem:[%s1445_s9 + $0x38] sm:$0xff]  ;;  %v923_v44 = vpack.c.bf16 %v378_v41, %v377_v38  ;;  %v361_v45 = vld [vmem:[%s1445_s9 + $0x130] sm:$0xff]  ;;  %v348_v48 = vld [vmem:[%s1445_s9 + $0xc8] sm:$0xff] }
  0x85   : > { %920 = vmatprep.subr.bf16.mxu1 %v919_v31  ;;  %v362_v46 = vld [vmem:[%s1445_s9 + $0x138] sm:$0xff]  ;;  %v379_v49 = vld [vmem:[%s1445_s9 + $0x1c0] sm:$0xff]  ;;  %v380_v50 = vld [vmem:[%s1445_s9 + $0x1c8] sm:$0xff]  ;;  %v893_v51 = vpack.c.bf16 %v330_v43, %v329_v42  ;;  %v895_v53 = vpack.c.bf16 %v348_v48, %v347_v47 }
  0x86   : > { %v925_v52 = vpack.c.bf16 %v362_v46, %v361_v45  ;;  %v331_v54 = vld [vmem:[%s1445_s9 + $0x40] sm:$0xff]  ;;  %v332_v55 = vld [vmem:[%s1445_s9 + $0x48] sm:$0xff]  ;;  %v927_v57 = vpack.c.bf16 %v380_v50, %v379_v49  ;;  %v349_v59 = vld [vmem:[%s1445_s9 + $0xd0] sm:$0xff]  ;;  %v1233_v49 = vmov (!%p749_p10), 0.0|0.0  }
  0x87   : > { %890 = vmatpush3.bf16.msra.mxu0 %v889_v35  ;;  %v363_v56 = vld [vmem:[%s1445_s9 + $0x140] sm:$0xff]  ;;  %v364_v58 = vld [vmem:[%s1445_s9 + $0x148] sm:$0xff]  ;;  %v350_v60 = vld [vmem:[%s1445_s9 + $0xd8] sm:$0xff]  ;;  %v897_v63 = vpack.c.bf16 %v332_v55, %v331_v54 }
  0x88   : > { %922 = vmatpush3.bf16.msra.mxu1 %v921_v39  ;;  %892 = vmatprep.subr.bf16.mxu0 %v891_v40  ;;  %v381_v61 = vld [vmem:[%s1445_s9 + $0x1d0] sm:$0xff]  ;;  %v382_v62 = vld [vmem:[%s1445_s9 + $0x1d8] sm:$0xff]  ;;  %v929_v0 = vpack.c.bf16 %v364_v58, %v363_v56  ;;  %v899_v1 = vpack.c.bf16 %v350_v60, %v349_v59  ;;  %v351_v7 = vld [vmem:[%s1445_s9 + $0xe0] sm:$0xff] }
  0x89   : > { %924 = vmatprep.subr.bf16.mxu1 %v923_v44  ;;  %v333_v2 = vld [vmem:[%s1445_s9 + $0x50] sm:$0xff]  ;;  %v334_v3 = vld [vmem:[%s1445_s9 + $0x58] sm:$0xff]  ;;  %v931_v5 = vpack.c.bf16 %v382_v62, %v381_v61  ;;  %v352_v8 = vld [vmem:[%s1445_s9 + $0xe8] sm:$0xff] }
  0x8a   : > { %v365_v4 = vld [vmem:[%s1445_s9 + $0x150] sm:$0xff]  ;;  %v366_v6 = vld [vmem:[%s1445_s9 + $0x158] sm:$0xff]  ;;  %v383_v9 = vld [vmem:[%s1445_s9 + $0x1e0] sm:$0xff]  ;;  %v901_v11 = vpack.c.bf16 %v334_v3, %v333_v2  ;;  %v903_v15 = vpack.c.bf16 %v352_v8, %v351_v7 }
  0x8b   : > { %894 = vmatpush3.bf16.msra.mxu0 %v893_v51  ;;  %v384_v10 = vld [vmem:[%s1445_s9 + $0x1e8] sm:$0xff]  ;;  %v335_v12 = vld [vmem:[%s1445_s9 + $0x60] sm:$0xff]  ;;  %v933_v14 = vpack.c.bf16 %v366_v6, %v365_v4  ;;  %v322_v18 = vld [vmem:[%s1438_s16 + $0x18] sm:$0xff] }
  0x8c   : > { %926 = vmatpush3.bf16.msra.mxu1 %v925_v52  ;;  %896 = vmatprep.subr.bf16.mxu0 %v895_v53  ;;  %v336_v13 = vld [vmem:[%s1445_s9 + $0x68] sm:$0xff]  ;;  %v367_v16 = vld [vmem:[%s1445_s9 + $0x160] sm:$0xff]  ;;  %v935_v19 = vpack.c.bf16 %v384_v10, %v383_v9  ;;  %v353_v21 = vld [vmem:[%s1445_s9 + $0xf0] sm:$0xff]  ;;  %v1235_v52 = vmov (!%p749_p10), 0.0  }
  0x8d   : > { %928 = vmatprep.subr.bf16.mxu1 %v927_v57  ;;  %v320_v17 = vld [vmem:[%s1438_s16 + $0x8] sm:$0xff]  ;;  %v354_v22 = vld [vmem:[%s1445_s9 + $0xf8] sm:$0xff]  ;;  %v385_v23 = vld [vmem:[%s1445_s9 + $0x1f0] sm:$0xff]  ;;  %521 = vmatprep.mubr.f32.mxu1 %v322_v18  ;;  %v905_v25 = vpack.c.bf16 %v336_v13, %v335_v12 }
  0x8e   : > { %v368_v20 = vld [vmem:[%s1445_s9 + $0x168] sm:$0xff]  ;;  %451 = vmatprep.mubr.f32.mxu0 %v320_v17  ;;  %v386_v24 = vld [vmem:[%s1445_s9 + $0x1f8] sm:$0xff]  ;;  %v907_v27 = vpack.c.bf16 %v354_v22, %v353_v21  ;;  %v337_v28 = vld [vmem:[%s1445_s9 + $0x70] sm:$0xff] }
  0x8f   : > { %898 = vmatpush3.bf16.msra.mxu0 %v897_v63  ;;  %v937_v26 = vpack.c.bf16 %v368_v20, %v367_v16  ;;  %v338_v29 = vld [vmem:[%s1445_s9 + $0x78] sm:$0xff]  ;;  %v939_v30 = vpack.c.bf16 %v386_v24, %v385_v23  ;;  %v369_v31 = vld [vmem:[%s1445_s9 + $0x170] sm:$0xff]  ;;  %v319_v35 = vld [vmem:[%s1438_s16] sm:$0xff] }
  0x90   : > { %930 = vmatpush3.bf16.msra.mxu1 %v929_v0  ;;  %900 = vmatprep.subr.bf16.mxu0 %v899_v1  ;;  %v370_v32 = vld [vmem:[%s1445_s9 + $0x178] sm:$0xff]  ;;  %v909_v33 = vpack.c.bf16 %v338_v29, %v337_v28  ;;  %v321_v36 = vld [vmem:[%s1438_s16 + $0x10] sm:$0xff]  ;;  %v534_v46 = vld [vmem:[#allocation8] sm:$0xff] (!%p749_p10) }
  0x91   : > { %932 = vmatprep.subr.bf16.mxu1 %v931_v5  ;;  %v941_v34 = vpack.c.bf16 %v370_v32, %v369_v31  ;;  %v318_v43 = vld [vmem:[#allocation2] sm:$0xff]  ;;  %v535_v47 = vld [vmem:[#allocation8 + $0x8] sm:$0xff] (!%p749_p10)  ;;  %v536_v48 = vld [vmem:[#allocation8 + $0x10] sm:$0xff] (!%p749_p10) }
  0x92   : > { %v944_v50 = vpack.c.bf16 (!%p749_p10), %v535_v47, %v534_v46  ;;  %v537_v51 = vld [vmem:[#allocation8 + $0x18] sm:$0xff] (!%p749_p10)  ;;  %v538_v54 = vld [vmem:[#allocation8 + $0x20] sm:$0xff] (!%p749_p10)  ;;  %v539_v55 = vld [vmem:[#allocation8 + $0x28] sm:$0xff] (!%p749_p10) }
  0x93   : > { %902 = vmatpush3.bf16.msra.mxu0 %v901_v11  ;;  %v947_v53 = vpack.c.bf16 (!%p749_p10), %v537_v51, %v536_v48  ;;  %v950_v56 = vpack.c.bf16 (!%p749_p10), %v539_v55, %v538_v54  ;;  %v540_v57 = vld [vmem:[#allocation8 + $0x30] sm:$0xff] (!%p749_p10)  ;;  %v541_v58 = vld [vmem:[#allocation8 + $0x38] sm:$0xff] (!%p749_p10)  ;;  %v542_v60 = vld [vmem:[#allocation8 + $0x40] sm:$0xff] (!%p749_p10) }
  0x94   : > { %934 = vmatpush3.bf16.msra.mxu1 %v933_v14  ;;  %904 = vmatprep.subr.bf16.mxu0 %v903_v15  ;;  %v953_v59 = vpack.c.bf16 (!%p749_p10), %v541_v58, %v540_v57  ;;  %v543_v61 = vld [vmem:[#allocation8 + $0x48] sm:$0xff] (!%p749_p10)  ;;  %v544_v63 = vld [vmem:[#allocation8 + $0x50] sm:$0xff] (!%p749_p10)  ;;  %v545_v0 = vld [vmem:[#allocation8 + $0x58] sm:$0xff] (!%p749_p10) }
  0x95   : > { %936 = vmatprep.subr.bf16.mxu1 %v935_v19  ;;  %v956_v62 = vpack.c.bf16 (!%p749_p10), %v543_v61, %v542_v60  ;;  %v959_v1 = vpack.c.bf16 (!%p749_p10), %v545_v0, %v544_v63  ;;  %v546_v2 = vld [vmem:[#allocation8 + $0x60] sm:$0xff] (!%p749_p10)  ;;  %v547_v3 = vld [vmem:[#allocation8 + $0x68] sm:$0xff] (!%p749_p10)  ;;  %v548_v5 = vld [vmem:[#allocation8 + $0x70] sm:$0xff] (!%p749_p10) }
  0x96   : > { %v962_v4 = vpack.c.bf16 (!%p749_p10), %v547_v3, %v546_v2  ;;  %v549_v6 = vld [vmem:[#allocation8 + $0x78] sm:$0xff] (!%p749_p10) }
  0x97   : > { %906 = vmatpush3.bf16.msra.mxu0 %v905_v25  ;;  %v965_v7 = vpack.c.bf16 (!%p749_p10), %v549_v6, %v548_v5  ;;  %v750_v9 = vld [vmem:[%s1576_s4] ss:$0 sm:$0xff] (!%p749_p10) }
  0x98   : > { %938 = vmatpush3.bf16.msra.mxu1 %v937_v26  ;;  %908 = vmatprep.subr.bf16.mxu0 %v907_v27 }
  0x99   : > { %940 = vmatprep.subr.bf16.mxu1 %v939_v30 }
  0x9b   : > { %910 = vmatpush3.bf16.msra.mxu0 %v909_v33 }
  0x9c   : > { %942 = vmatpush3.bf16.msra.mxu1 %v941_v34  ;;  %943 = vmatprep.subr.bf16.mxu0 (!%p749_p10), %v1233_v49 }
  0x9e   : > { %452 = vmatmul.mubr.f32.vlgmr.msra.gmra.mrb[0].mxu0 %v319_v35 }
  0x9f   : > { %522 = vmatmul.mubr.f32.vlgmr.msra.gmra.mrb[0].mxu1 %v321_v36  ;;  %876 = vmatprep.mubr.msk.f32.mxu0 (!%p749_p10), %vm1234_vm0, %v1235_v52 }
  0xa0   : > { %945 = vmatpush3.bf16.msra.mxu0 (!%p749_p10), %v944_v50 }
  0xa1   : > { %946 = vmatprep.subr.bf16.mxu0 (!%p749_p10), %v1233_v49 }
  0xa4   : > { %948 = vmatpush3.bf16.msra.mxu0 (!%p749_p10), %v947_v53 }
  0xa5   : > { %949 = vmatprep.subr.bf16.mxu0 (!%p749_p10), %v1233_v49 }
  0xa8   : > { %951 = vmatpush3.bf16.msra.mxu0 (!%p749_p10), %v950_v56 }
  0xa9   : > { %952 = vmatprep.subr.bf16.mxu0 (!%p749_p10), %v1233_v49 }
  0xac   : > { %954 = vmatpush3.bf16.msra.mxu0 (!%p749_p10), %v953_v59 }
  0xad   : > { %955 = vmatprep.subr.bf16.mxu0 (!%p749_p10), %v1233_v49 }
  0xb0   : > { %957 = vmatpush3.bf16.msra.mxu0 (!%p749_p10), %v956_v62 }
  0xb1   : > { %958 = vmatprep.subr.bf16.mxu0 (!%p749_p10), %v1233_v49 }
  0xb4   : > { %960 = vmatpush3.bf16.msra.mxu0 (!%p749_p10), %v959_v1 }
  0xb5   : > { %961 = vmatprep.subr.bf16.mxu0 (!%p749_p10), %v1233_v49 }
  0xb8   : > { %963 = vmatpush3.bf16.msra.mxu0 (!%p749_p10), %v962_v4 }
  0xb9   : > { %964 = vmatprep.subr.bf16.mxu0 (!%p749_p10), %v1233_v49 }
  0xbc   : > { %966 = vmatpush3.bf16.msra.mxu0 (!%p749_p10), %v965_v7 }
 0x171   : > { %v789_v37 = vpop.f32.mrb[0].mxu0 }
 0x172   : > { %v824_v38 = vpop.f32.mrb[0].mxu1  ;;  %v790_v39 = vpop.f32.mrb[1].mxu0 }
 0x173   : > { %v791_v40 = vadd.f32 %v790_v39, %v789_v37  ;;  %v825_v41 = vpop.f32.mrb[1].mxu1 }
 0x174   : > { %v826_v42 = vadd.f32 %v825_v41, %v824_v38  ;;  %532 = sbr.rel (%p749_p10) target bundleno = 601 (0x259), region = 60 }
 0x176   : > { %v524_v44 = vadd.f32 %v826_v42, %v791_v40 }
 0x178   : > { %v527_v45 = vadd.f32 %v524_v44, %v318_v43 }
 0x17a   : > { %528 = vst [vmem:[#allocation2] sm:$0xff] %v527_v45 }
 0x181   : > { %v533_v8 = vld [vmem:[#allocation2] sm:$0xff] }
 0x182   : > { %877 = vmatmul.mubr.f32.vlgmr.msra.gmra.mrb[0].mxu0 %v533_v8 }
 0x255   : > { %v623_v10 = vpop.f32.mrb[0].mxu0 }
 0x256   : > { %v624_v11 = vadd.f32 %v750_v9, %v623_v10  ;;  %v878_v12 = vpop.f32.mrb[1].mxu0 }
 0x258   : > { %627 = vst [vmem:[#allocation9] sm:$0xff] %v624_v11 }
 0x259 PF: > { %p993_p11 = scmp.eq.s32.totalorder %s1296_s24, 1  ;;  %s1236_s18 = smov [#allocation9]  }
 0x25a   : > { %s637_s7 = sshll.u32 %s1236_s18, 4  ;;  %s638_s7 = int_to_ptr.vmem [resolvable:$true] %s637_s7 }
 0x25b   : > { %s1138_s27 = scalar_lea.vmem %s638_s7, 128  ;;  %p1145_p0 = scmp.lt.s32.totalorder %s638_s7, %s638_s7 }
 0x25c   : > { %p1139_p13 = scmp.ne.s32.totalorder %s638_s7, %s1138_s27  ;;  %p1146_p6 = scmp.lt.s32.totalorder %s1138_s27, %s1138_s27 }
 0x25e   : > { %p1140_p2 = pnand %p1139_p13, %p993_p11  ;;  %p1147_p4 = por %p1146_p6, %p1145_p0 }
 0x260   : > { %p1141_p3 = pneg %p1140_p2 }
 0x262   : > { %p1148_p5 = pnand %p1147_p4, %p1141_p3 }
 0x264   : > { %1151 = shalt.err (!%p1148_p5)
}
 0x265   : > { %s1152_s29 = scalar_lea.hbm %s1577_s5, 128 }
 0x266   : > { %p1153_p12 = scmp.ne.s32.totalorder %s1577_s5, %s1152_s29  ;;  %p1158_p8 = scmp.lt.u32.totalorder %s1152_s29, %s1577_s5 }
 0x268   : > { %p1154_p1 = pnand %p1153_p12, %p993_p11 }
 0x26a   : > { %p1155_p7 = pneg %p1154_p1 }
 0x26c   : > { %p1160_p9 = pnand %p1158_p8, %p1155_p7 }
 0x26e   : > { %1163 = shalt.err (!%p1160_p9)
}
 0x26f   : > { %976 = dma.vmem_to_hbm [thread:$0]  (%p993_p11), %s638_s7, 128, %s1577_s5, [#allocation5]  }
 0x270   : > { %1201 = dma.done.wait (%p993_p11), [#allocation5], 128  }
 0x271   : > { %1203 = vsyncadd (%p993_p11), [#allocation5], 4294967168 }
 0x272 PF: > { %s22_s23 = sadd.s32 1, %s1226_s23   ;;  %s1593_s18 = smov %s1210_s19 }
 0x273   : > { %p19_p10 = scmp.ge.s32.totalorder %s22_s23, 4   ;;  %s1594_s19 = smov %s1214_s20 }
 0x274   : > { %s1595_s20 = smov %s1355_s8  ;;  %s1596_s21 = smov %s1222_s22 }
 0x275   : > { %s1597_s22 = smov %s1599_s30  ;;  %21 = sbr.rel (!%p19_p10) target bundleno = 7 (0x7), region = 103 }
 0x27c   :  { %650 = vsyncpa [#allocation4], 1 }
 0x27d   :  { %652 = vsyncpa [#allocation4 + $0x1], 1 }
 0x27e   :  { %653 = vsyncpa [#allocation7], 1 }
 0x27f   :  { %655 = vsyncpa [#allocation7 + $0x1], 1 }
 0x280   :  { %656 = vsyncpa [#allocation5], 1 }
 0x281   :  { %658 = vsyncpa [#allocation5 + $0x1], 1 }

</bundles_post_ra>
